<compile_context>
chip_gen: v5e
topology: v5e:2x2
jax: 0.10.0
libtpu: 0.0.40
codegen_flags: <defaults>
</compile_context>

<pallas_src>
import functools

import jax
import jax.numpy as jnp
from jax import lax
from jax.experimental import pallas as pl
from jax.experimental.pallas import tpu as pltpu


def _cdiv(a: int, b: int) -> int:
    return -(-a // b)


def _dura_distmulth_p_kernel(h_ref, r_ref, t_ref, out_ref, *,
                             w, rows_total, tile_r, need_mask):
    i = pl.program_id(0)

    @pl.when(i == 0)
    def _():
        out_ref[...] = jnp.zeros_like(out_ref)

    h = h_ref[...].astype(jnp.float32)
    r = r_ref[...].astype(jnp.float32)
    t = t_ref[...].astype(jnp.float32)

    # (h^2 + t^2) * (w + r^2) == w*(h^2 + t^2) + h^2*r^2 + t^2*r^2
    elem = (h * h + t * t) * (w + r * r)
    width = elem.shape[1]

    def fold(x):
        # Fold tile rows into the resident (8, width) accumulator block.
        return x.reshape(tile_r // 8, 8, width).sum(axis=0)

    if need_mask:
        last = pl.num_programs(0) - 1

        @pl.when(i != last)
        def _():
            out_ref[...] += fold(elem)

        @pl.when(i == last)
        def _():
            # Rows past the real extent (padded partial block) contribute zero.
            row_ids = lax.broadcasted_iota(jnp.int32, (tile_r, 1), 0) + i * tile_r
            out_ref[...] += fold(jnp.where(row_ids < rows_total, elem, 0.0))
    else:
        out_ref[...] += fold(elem)


def dura_distmulth_p(h, r, t, *, weight: float, w: float,
                     vmem_limit_bytes: int = 48 * 1024 * 1024,
                     max_tile_rows: int | None = None):
    """Pallas implementation of DURA_DistMultH_P.forward((h, r, t))."""
    B, D = h.shape
    assert r.shape == (B, D) and t.shape == (B, D)
    dtype = h.dtype
    itemsize = jnp.dtype(dtype).itemsize
    N = B * D

    # Lane-dense layout: the math is elementwise + global sum, so any
    # consistent reshape of all three operands is exactly equivalent.
    if N % 128 == 0:
        width = 128
        rows = N // 128
        h2 = h.reshape(rows, width)
        r2 = r.reshape(rows, width)
        t2 = t.reshape(rows, width)
    else:
        width = D
        rows = B
        h2, r2, t2 = h, r, t

    # Sublane multiple for this dtype: f32 -> 8, bf16 -> 16, int8/fp8 -> 32.
    sub = max(8, 32 // itemsize)

    # Tile sizing against an explicit VMEM budget:
    #   3 inputs x 2 pipeline buffers (native dtype) + ~3 f32 blocks of
    #   elementwise temporaries.  Lanes pad to 128 physically when width<128.
    lanes = _cdiv(width, 128) * 128
    per_row_bytes = lanes * (6 * itemsize + 3 * 4)
    block_budget = (vmem_limit_bytes * 2) // 3
    tile_r = max(sub, (block_budget // per_row_bytes) // sub * sub)
    rows_pad = _cdiv(rows, sub) * sub
    tile_r = min(tile_r, rows_pad)
    if max_tile_rows is not None:
        tile_r = min(tile_r, max(sub, (max_tile_rows // sub) * sub))

    num_tiles = _cdiv(rows, tile_r)
    need_mask = (num_tiles * tile_r) != rows

    in_spec = pl.BlockSpec((tile_r, width), lambda i: (i, 0))
    # NOTE: pipeline_mode=pl.Buffered(3) on the input specs is a possible
    # sweep if a profile shows exposed DMA between steps; not a default.

    kernel = functools.partial(
        _dura_distmulth_p_kernel,
        w=float(w), rows_total=rows, tile_r=tile_r, need_mask=need_mask)

    partial = pl.pallas_call(
        kernel,
        out_shape=jax.ShapeDtypeStruct((8, width), jnp.float32),
        grid_spec=pltpu.PrefetchScalarGridSpec(
            num_scalar_prefetch=0,
            grid=(num_tiles,),
            in_specs=[in_spec, in_spec, in_spec],
            out_specs=pl.BlockSpec((8, width), lambda i: (0, 0)),
        ),
        compiler_params=pltpu.CompilerParams(
            dimension_semantics=("arbitrary",),
            vmem_limit_bytes=int(vmem_limit_bytes)),
        cost_estimate=pl.CostEstimate(
            flops=6 * N,
            transcendentals=0,
            bytes_accessed=3 * N * itemsize + 8 * width * 4),
    )(h2, r2, t2)

    # Single epilogue reduce + final scaling: weight * norm / h.shape[0]
    return (weight / B) * jnp.sum(partial)


def dura_distmulth_p_ref(h, r, t, *, weight: float, w: float):
    h = h.astype(jnp.float32)
    r = r.astype(jnp.float32)
    t = t.astype(jnp.float32)
    norm = w * jnp.sum(t ** 2 + h ** 2)
    norm += jnp.sum(h ** 2 * r ** 2 + t ** 2 * r ** 2)
    return weight * norm / h.shape[0]


if __name__ == "__main__":
    key = jax.random.PRNGKey(0)
    kh, kr, kt = jax.random.split(key, 3)

    weight = 0.05  # regularization weight
    w = 0.5        # DURA_DistMultH_P `w` hyperparameter

    # 1) Small demo shape: 16 triples, embedding dim 128 (aligned path).
    B, D = 16, 128
    h = jax.random.normal(kh, (B, D), dtype=jnp.float32)
    r = jax.random.normal(kr, (B, D), dtype=jnp.float32)
    t = jax.random.normal(kt, (B, D), dtype=jnp.float32)

    out = jax.block_until_ready(dura_distmulth_p(h, r, t, weight=weight, w=w))
    ref = dura_distmulth_p_ref(h, r, t, weight=weight, w=w)
    assert jnp.allclose(out, ref, rtol=1e-4, atol=1e-5), (out, ref)

    # 2) Ragged / multi-tile path: B*D flattens lane-dense, small tile forces
    #    several grid steps and a masked tail tile.
    B2, D2 = 300, 64
    h2 = jax.random.normal(kh, (B2, D2), dtype=jnp.float32)
    r2 = jax.random.normal(kr, (B2, D2), dtype=jnp.float32)
    t2 = jax.random.normal(kt, (B2, D2), dtype=jnp.float32)

    out2 = jax.block_until_ready(
        dura_distmulth_p(h2, r2, t2, weight=weight, w=w, max_tile_rows=64))
    ref2 = dura_distmulth_p_ref(h2, r2, t2, weight=weight, w=w)
    assert jnp.allclose(out2, ref2, rtol=1e-4, atol=1e-5), (out2, ref2)

    # 3) bf16 inputs streamed in native dtype (halves HBM bytes); upcast to
    #    f32 only inside VMEM.
    B3, D3 = 64, 96
    h3 = jax.random.normal(kh, (B3, D3), dtype=jnp.bfloat16)
    r3 = jax.random.normal(kr, (B3, D3), dtype=jnp.bfloat16)
    t3 = jax.random.normal(kt, (B3, D3), dtype=jnp.bfloat16)

    out3 = jax.block_until_ready(dura_distmulth_p(h3, r3, t3, weight=weight, w=w))
    ref3 = dura_distmulth_p_ref(h3, r3, t3, weight=weight, w=w)
    assert jnp.allclose(out3, ref3, rtol=1e-3, atol=1e-4), (out3, ref3)

    print("KERNEL_OK")
</pallas_src>

<mosaic_0001>
module attributes {stable_mosaic.version = 11 : i64} {
  func.func @_dura_distmulth_p_kernel(%arg0: i32, %arg1: memref<16x128xf32, #tpu.memory_space<vmem>>, %arg2: memref<16x128xf32, #tpu.memory_space<vmem>>, %arg3: memref<16x128xf32, #tpu.memory_space<vmem>>, %arg4: memref<8x128xf32, #tpu.memory_space<vmem>>) attributes {dimension_semantics = [#tpu.dimension_semantics<arbitrary>], iteration_bounds = array<i64: 1>, scalar_prefetch = 0 : i64, scratch_operands = 0 : i64, tpu.core_type = #tpu.core_type<tc>, window_params = [{transform_indices = @transform_0, window_bounds = array<i64: 16, 128>}, {transform_indices = @transform_1, window_bounds = array<i64: 16, 128>}, {transform_indices = @transform_2, window_bounds = array<i64: 16, 128>}, {pipeline_mode = #tpu.pipeline_mode<synchronous>, transform_indices = @transform_3, window_bounds = array<i64: 8, 128>}]} {
    %c0_i32 = arith.constant 0 : i32
    %0 = arith.cmpi eq, %arg0, %c0_i32 : i32
    %1 = arith.extui %0 : i1 to i32
    %c0_i32_0 = arith.constant 0 : i32
    %2 = arith.cmpi ne, %1, %c0_i32_0 : i32
    scf.if %2 {
      %cst_11 = arith.constant 0.000000e+00 : f32
      %18 = vector.broadcast %cst_11 : f32 to vector<8x128xf32>
      %c0_12 = arith.constant 0 : index
      %c0_13 = arith.constant 0 : index
      %19 = vector.load %arg4[%c0_12, %c0_13] : memref<8x128xf32, #tpu.memory_space<vmem>>, vector<8x128xf32>
      tpu.vector_store %arg4[%c0_12, %c0_13], %18 {strides = array<i32>} : memref<8x128xf32, #tpu.memory_space<vmem>>, vector<8x128xf32>,
    } else {
    }
    %c0 = arith.constant 0 : index
    %c0_1 = arith.constant 0 : index
    %3 = vector.load %arg1[%c0, %c0_1] : memref<16x128xf32, #tpu.memory_space<vmem>>, vector<16x128xf32>
    %c0_2 = arith.constant 0 : index
    %c0_3 = arith.constant 0 : index
    %4 = vector.load %arg2[%c0_2, %c0_3] : memref<16x128xf32, #tpu.memory_space<vmem>>, vector<16x128xf32>
    %c0_4 = arith.constant 0 : index
    %c0_5 = arith.constant 0 : index
    %5 = vector.load %arg3[%c0_4, %c0_5] : memref<16x128xf32, #tpu.memory_space<vmem>>, vector<16x128xf32>
    %6 = arith.mulf %3, %3 : vector<16x128xf32>
    %7 = arith.mulf %5, %5 : vector<16x128xf32>
    %8 = arith.addf %6, %7 : vector<16x128xf32>
    %9 = arith.mulf %4, %4 : vector<16x128xf32>
    %cst = arith.constant 5.000000e-01 : f32
    %10 = vector.broadcast %cst : f32 to vector<16x128xf32>
    %11 = arith.addf %10, %9 : vector<16x128xf32>
    %12 = arith.mulf %8, %11 : vector<16x128xf32>
    %c0_6 = arith.constant 0 : index
    %c0_7 = arith.constant 0 : index
    %13 = vector.load %arg4[%c0_6, %c0_7] : memref<8x128xf32, #tpu.memory_space<vmem>>, vector<8x128xf32>
    %14 = vector.shape_cast %12 : vector<16x128xf32> to vector<2x8x128xf32>
    %cst_8 = arith.constant dense<0.000000e+00> : vector<8x128xf32>
    %15 = vector.multi_reduction <add>, %14, %cst_8 [0] : vector<2x8x128xf32> to vector<8x128xf32>
    %16 = arith.addf %13, %15 : vector<8x128xf32>
    %c0_9 = arith.constant 0 : index
    %c0_10 = arith.constant 0 : index
    %17 = vector.load %arg4[%c0_9, %c0_10] : memref<8x128xf32, #tpu.memory_space<vmem>>, vector<8x128xf32>
    tpu.vector_store %arg4[%c0_9, %c0_10], %16 {strides = array<i32>} : memref<8x128xf32, #tpu.memory_space<vmem>>, vector<8x128xf32>,
    return
  }
  func.func @transform_0(%arg0: i32) -> (i32, i32) {
    %c0_i32 = arith.constant 0 : i32
    %c0_i32_0 = arith.constant 0 : i32
    return %arg0, %c0_i32 : i32, i32
  }
  func.func @transform_1(%arg0: i32) -> (i32, i32) {
    %c0_i32 = arith.constant 0 : i32
    %c0_i32_0 = arith.constant 0 : i32
    return %arg0, %c0_i32 : i32, i32
  }
  func.func @transform_2(%arg0: i32) -> (i32, i32) {
    %c0_i32 = arith.constant 0 : i32
    %c0_i32_0 = arith.constant 0 : i32
    return %arg0, %c0_i32 : i32, i32
  }
  func.func @transform_3(%arg0: i32) -> (i32, i32) {
    %c0_i32 = arith.constant 0 : i32
    %c0_i32_0 = arith.constant 0 : i32
    %c0_i32_1 = arith.constant 0 : i32
    return %c0_i32, %c0_i32_0 : i32, i32
  }
}

</mosaic_0001>

<bundles_post_ra>
// kernel: tpu_custom_call.1
= control target key start
LH: loop header
LB: loop body
LE: loop exit
PB: predicated region body
PF: predicated region fallthrough
CT: control target
= control target key end

     0   :  { %8 = vsyncpa [#allocation3], 0  ;;  %s254_s0 = inlined_call_operand.hbm [shape: f32[16,128], index: 0, kind: input, shape index: {}]   ;;  %s255_s1 = inlined_call_operand.hbm [shape: f32[16,128], index: 1, kind: input, shape index: {}]   ;;  %s256_s2 = inlined_call_operand.hbm [shape: f32[16,128], index: 2, kind: input, shape index: {}]   ;;  %s257_s3 = inlined_call_operand.hbm [shape: f32[8,128], index: 3, kind: output, shape index: {}]  }
   0x1   :  { %9 = vsyncpa [#allocation6], 0 }
   0x2   :  { %10 = vsyncpa [#allocation4], 0  ;;  %s28_s14 = sshll.u32 %s255_s1, 4  ;;  %s216_s15 = smov [#allocation5]   ;;  %s29_s14 = int_to_ptr.hbm [resolvable:$true] %s28_s14 }
   0x3   :  { %s30_s16 = sshll.u32 %s216_s15, 4  ;;  %s15_s19 = sshll.u32 %s254_s0, 4  ;;  %s31_s16 = int_to_ptr.vmem [resolvable:$true] %s30_s16  ;;  %s16_s19 = int_to_ptr.hbm [resolvable:$true] %s15_s19 }
   0x4   :  { %s217_s20 = smov 128   ;;  %s218_s21 = smov 8  }
   0x5   :  { %36 = dma.hbm_to_vmem [thread:$0]  %s29_s14, 256, %s31_s16, [#allocation6], %s217_s20, %s217_s20, %s218_s21  }
   0x6   :  { %s219_s22 = smov [#allocation2]   ;;  %s41_s26 = sshll.u32 %s256_s2, 4  ;;  %s42_s26 = int_to_ptr.hbm [resolvable:$true] %s41_s26 }
   0x7   :  { %s17_s23 = sshll.u32 %s219_s22, 4  ;;  %s220_s1 = smov [#allocation7]   ;;  %s18_s23 = int_to_ptr.vmem [resolvable:$true] %s17_s23 }
   0x8   :  { %23 = dma.hbm_to_vmem [thread:$0]  %s16_s19, 256, %s18_s23, [#allocation3], %s217_s20, %s217_s20, %s218_s21  }
   0x9   :  { %s43_s27 = sshll.u32 %s220_s1, 4  ;;  %s44_s27 = int_to_ptr.vmem [resolvable:$true] %s43_s27 }
   0xa   :  { %49 = dma.hbm_to_vmem [thread:$0]  %s42_s26, 256, %s44_s27, [#allocation6], %s217_s20, %s217_s20, %s218_s21  }
   0xb   :  { %210 = dma.done.wait [#allocation3], 256  }
   0xc   :  { %211 = vsyncadd [#allocation3], 4294967040 }
   0xd   :  { %212 = dma.done.wait [#allocation6], 512  }
   0xe   :  { %213 = vsyncadd [#allocation6], 4294966784  ;;  %v67_v0 = vld [vmem:[#allocation2] sm:$0xff]  ;;  %v68_v1 = vld [vmem:[#allocation2 + $0x8] sm:$0xff]  ;;  %s221_s0 = smov [#allocation8]   ;;  %s96_s30 = sshll.u32 %s257_s3, 4  ;;  %s97_s30 = int_to_ptr.hbm [resolvable:$true] %s96_s30 }
   0xf   :  { %v69_v2 = vld [vmem:[#allocation5] sm:$0xff]  ;;  %v70_v3 = vld [vmem:[#allocation5 + $0x8] sm:$0xff]  ;;  %v71_v4 = vld [vmem:[#allocation7] sm:$0xff]  ;;  %v73_v6 = vmul.f32 %v67_v0, %v67_v0  ;;  %v74_v7 = vmul.f32 %v68_v1, %v68_v1  ;;  %s94_s2 = sshll.u32 %s221_s0, 4  ;;  %s95_s2 = int_to_ptr.vmem [resolvable:$true] %s94_s2 }
  0x10   :  { %v72_v5 = vld [vmem:[#allocation7 + $0x8] sm:$0xff]  ;;  %v79_v8 = vmul.f32 %v69_v2, %v69_v2  ;;  %v75_v9 = vmul.f32 %v71_v4, %v71_v4  ;;  %v80_v11 = vmul.f32 %v70_v3, %v70_v3 }
  0x11   :  { %v76_v10 = vmul.f32 %v72_v5, %v72_v5 }
  0x12   :  { %v81_v12 = vadd.f32 0.5, %v79_v8  ;;  %v77_v13 = vadd.f32 %v75_v9, %v73_v6  ;;  %v82_v15 = vadd.f32 0.5, %v80_v11 }
  0x13   :  { %v78_v14 = vadd.f32 %v76_v10, %v74_v7 }
  0x14   :  { %v83_v16 = vmul.f32 %v81_v12, %v77_v13 }
  0x15   :  { %v84_v17 = vmul.f32 %v82_v15, %v78_v14 }
  0x17   :  { %v86_v18 = vadd.f32 %v84_v17, %v83_v16 }
  0x19   :  { %88 = vst [vmem:[#allocation8] sm:$0xff] %v86_v18 }
  0x1a   :  { %99 = dma.vmem_to_hbm [thread:$0]  %s95_s2, 128, %s97_s30, [#allocation4]  }
  0x1b   :  { %214 = dma.done.wait [#allocation4], 128  }
  0x1c   :  { %215 = vsyncadd [#allocation4], 4294967168 }
  0x1d   :  { %104 = vsyncpa [#allocation3], 1 }
  0x1e   :  { %105 = vsyncpa [#allocation6], 1 }
  0x1f   :  { %106 = vsyncpa [#allocation4], 1 }

</bundles_post_ra>
